<compile_context>
chip_gen: v7x
topology: tpu7x:2x2x1
jax: 0.10.0
libtpu: 0.0.40
codegen_flags: <defaults>
</compile_context>

<pallas_src>
import jax
import jax.numpy as jnp
from jax import lax
from jax.experimental import pallas as pl
from jax.experimental.pallas import tpu as pltpu


def _round_up(x: int, m: int) -> int:
    return ((x + m - 1) // m) * m


# ---------------------------------------------------------------------------
# forward(users, items): sigmoid(sum(users_emb * items_emb, dim=1))
# ---------------------------------------------------------------------------
def _forward_kernel(u_ref, v_ref, o_ref):
    # (TB, D) elementwise product on the VPU.
    p = u_ref[...] * v_ref[...]
    # Row-sum via a ones-vector matmul: the result lands lane-major as a
    # (1, TB) row (lane-dense store) instead of a (TB, 1) column that would
    # need masked partial stores.
    ones = jnp.ones((1, p.shape[1]), jnp.float32)
    s = lax.dot_general(ones, p, (((1,), (1,)), ((), ())),
                        preferred_element_type=jnp.float32)      # (1, TB)
    o_ref[...] = jax.nn.sigmoid(s)


def puremf_forward(user_table, item_table, users, items, *, block_b=512):
    users_emb = jnp.take(user_table, users, axis=0).astype(jnp.float32)  # (B, D)
    items_emb = jnp.take(item_table, items, axis=0).astype(jnp.float32)  # (B, D)
    B, D = users_emb.shape

    tb = min(block_b, _round_up(B, 128))          # lane-aligned output tile
    b_pad = _round_up(B, tb)
    if b_pad != B:
        pad = ((0, b_pad - B), (0, 0))
        users_emb = jnp.pad(users_emb, pad)
        items_emb = jnp.pad(items_emb, pad)

    out = pl.pallas_call(
        _forward_kernel,
        out_shape=jax.ShapeDtypeStruct((1, b_pad), jnp.float32),
        grid=(b_pad // tb,),
        in_specs=[
            pl.BlockSpec((tb, D), lambda i: (i, 0)),
            pl.BlockSpec((tb, D), lambda i: (i, 0)),
        ],
        out_specs=pl.BlockSpec((1, tb), lambda i: (0, i)),
        compiler_params=pltpu.CompilerParams(
            dimension_semantics=("parallel",),
            vmem_limit_bytes=32 * 1024 * 1024,
        ),
    )(users_emb, items_emb)
    return out[0, :B]                             # (B,) like torch forward


# ---------------------------------------------------------------------------
# getUsersRating(users): sigmoid(users_emb @ item_table.T)
# ---------------------------------------------------------------------------
def _rating_kernel(u_ref, it_ref, o_ref):
    # Contract the shared last (latent) dim directly — no in-kernel .T; the
    # row-major item tile feeds the MXU as-is.
    scores = lax.dot_general(
        u_ref[...], it_ref[...],
        dimension_numbers=(((1,), (1,)), ((), ())),
        preferred_element_type=jnp.float32)                      # (TB, TN)
    o_ref[...] = jax.nn.sigmoid(scores)


def puremf_get_users_rating(user_table, item_table, users, *,
                            block_b=256, block_n=512):
    users_emb = jnp.take(user_table, users, axis=0).astype(jnp.float32)  # (B, D)
    item_tab = item_table.astype(jnp.float32)                            # (N, D)
    B, D = users_emb.shape
    N = item_tab.shape[0]

    tb = min(block_b, _round_up(B, 8))
    tn = min(block_n, _round_up(N, 128))
    b_pad = _round_up(B, tb)
    n_pad = _round_up(N, tn)
    if b_pad != B:
        users_emb = jnp.pad(users_emb, ((0, b_pad - B), (0, 0)))
    if n_pad != N:
        item_tab = jnp.pad(item_tab, ((0, n_pad - N), (0, 0)))

    out = pl.pallas_call(
        _rating_kernel,
        out_shape=jax.ShapeDtypeStruct((b_pad, n_pad), jnp.float32),
        grid=(b_pad // tb, n_pad // tn),
        in_specs=[
            pl.BlockSpec((tb, D), lambda i, j: (i, 0)),   # users tile (resident over j)
            pl.BlockSpec((tn, D), lambda i, j: (j, 0)),   # item-table tile streams over j
        ],
        out_specs=pl.BlockSpec((tb, tn), lambda i, j: (i, j)),
        compiler_params=pltpu.CompilerParams(
            dimension_semantics=("parallel", "parallel"),
            vmem_limit_bytes=32 * 1024 * 1024,
        ),
    )(users_emb, item_tab)
    return out[:B, :N]


if __name__ == "__main__":
    # Deterministic synthetic parameters (nn.init.normal_(std=0.1) equivalent).
    num_users, num_items, latent_dim = 64, 48, 128
    batch = 8

    key = jax.random.PRNGKey(0)
    k_user, k_item, k_u_idx, k_i_idx = jax.random.split(key, 4)
    user_table = 0.1 * jax.random.normal(k_user, (num_users, latent_dim), jnp.float32)
    item_table = 0.1 * jax.random.normal(k_item, (num_items, latent_dim), jnp.float32)

    users = jax.random.randint(k_u_idx, (batch,), 0, num_users, dtype=jnp.int32)
    items = jax.random.randint(k_i_idx, (batch,), 0, num_items, dtype=jnp.int32)

    # --- forward() ---
    scores = jax.block_until_ready(
        puremf_forward(user_table, item_table, users, items))
    scores_ref = jax.nn.sigmoid(
        jnp.sum(jnp.take(user_table, users, axis=0)
                * jnp.take(item_table, items, axis=0), axis=1))
    assert scores.shape == (batch,)
    # MXU reductions run at the default TPU matmul precision; allow bf16-pass slack.
    assert jnp.allclose(scores, scores_ref, atol=2e-3, rtol=2e-3)

    # --- getUsersRating() ---
    ratings = jax.block_until_ready(
        puremf_get_users_rating(user_table, item_table, users))
    ratings_ref = jax.nn.sigmoid(
        jnp.take(user_table, users, axis=0) @ item_table.T)
    assert ratings.shape == (batch, num_items)
    assert jnp.allclose(ratings, ratings_ref, atol=2e-3, rtol=2e-3)

    print("KERNEL_OK")
</pallas_src>

<mosaic_0001>
module attributes {stable_mosaic.version = 11 : i64} {
  func.func @_forward_kernel(%arg0: i32, %arg1: memref<128x128xf32, #tpu.memory_space<vmem>>, %arg2: memref<128x128xf32, #tpu.memory_space<vmem>>, %arg3: memref<1x128xf32, #tpu.memory_space<vmem>>) attributes {dimension_semantics = [#tpu.dimension_semantics<parallel>], iteration_bounds = array<i64: 1>, scalar_prefetch = 0 : i64, scratch_operands = 0 : i64, tpu.core_type = #tpu.core_type<tc>, window_params = [{transform_indices = @transform_0, window_bounds = array<i64: 128, 128>}, {transform_indices = @transform_1, window_bounds = array<i64: 128, 128>}, {transform_indices = @transform_2, window_bounds = array<i64: 1, 128>}]} {
    %c0 = arith.constant 0 : index
    %c0_0 = arith.constant 0 : index
    %0 = vector.load %arg1[%c0, %c0_0] : memref<128x128xf32, #tpu.memory_space<vmem>>, vector<128x128xf32>
    %c0_1 = arith.constant 0 : index
    %c0_2 = arith.constant 0 : index
    %1 = vector.load %arg2[%c0_1, %c0_2] : memref<128x128xf32, #tpu.memory_space<vmem>>, vector<128x128xf32>
    %2 = arith.mulf %0, %1 : vector<128x128xf32>
    %cst = arith.constant 1.000000e+00 : f32
    %3 = vector.broadcast %cst : f32 to vector<1x128xf32>
    %cst_3 = arith.constant dense<0.000000e+00> : vector<1x128xf32>
    %4 = tpu.matmul %3, %2, %cst_3 {dimension_numbers = #tpu.dot_dimension_numbers<[1], [1], [0], [0], [0, 0, 1, 0], [], []>} : vector<1x128xf32>, vector<128x128xf32>, vector<1x128xf32> -> vector<1x128xf32>
    %5 = arith.negf %4 : vector<1x128xf32>
    %6 = math.exp %5 : vector<1x128xf32>
    %cst_4 = arith.constant 1.000000e+00 : f32
    %7 = vector.broadcast %cst_4 : f32 to vector<1x128xf32>
    %8 = arith.addf %7, %6 : vector<1x128xf32>
    %9 = arith.divf %7, %8 : vector<1x128xf32>
    %c0_5 = arith.constant 0 : index
    %c0_6 = arith.constant 0 : index
    %10 = vector.load %arg3[%c0_5, %c0_6] : memref<1x128xf32, #tpu.memory_space<vmem>>, vector<1x128xf32>
    tpu.vector_store %arg3[%c0_5, %c0_6], %9 {strides = array<i32>} : memref<1x128xf32, #tpu.memory_space<vmem>>, vector<1x128xf32>,
    return
  }
  func.func @transform_0(%arg0: i32) -> (i32, i32) {
    %c0_i32 = arith.constant 0 : i32
    %c0_i32_0 = arith.constant 0 : i32
    return %arg0, %c0_i32 : i32, i32
  }
  func.func @transform_1(%arg0: i32) -> (i32, i32) {
    %c0_i32 = arith.constant 0 : i32
    %c0_i32_0 = arith.constant 0 : i32
    return %arg0, %c0_i32 : i32, i32
  }
  func.func @transform_2(%arg0: i32) -> (i32, i32) {
    %c0_i32 = arith.constant 0 : i32
    %c0_i32_0 = arith.constant 0 : i32
    return %c0_i32, %arg0 : i32, i32
  }
}

</mosaic_0001>

<bundles_post_ra>
// kernel: tpu_custom_call.1
= control target key start
LH: loop header
LB: loop body
LE: loop exit
PB: predicated region body
PF: predicated region fallthrough
CT: control target
= control target key end

     0   :  { %7 = vsyncpa [#allocation3], 0  ;;  %s411_s0 = inlined_call_operand.hbm [shape: f32[128,128], index: 0, kind: input, shape index: {}]   ;;  %s412_s1 = inlined_call_operand.hbm [shape: f32[128,128], index: 1, kind: input, shape index: {}]   ;;  %s413_s2 = inlined_call_operand.hbm [shape: f32[1,128], index: 2, kind: output, shape index: {}]  }
   0x1   :  { %8 = vsyncpa [#allocation6], 0 }
   0x2   :  { %9 = vsyncpa [#allocation4], 0  ;;  %s343_s9 = smov [#allocation2]   ;;  %s271_s13 = scalar_lea.hbm %s411_s0, 2048 }
   0x3   :  { %s15_s10 = sshll.u32 %s343_s9, 4  ;;  %p272_p0 = scmp.ne.s32.totalorder %s411_s0, %s271_s13  ;;  %s16_s10 = int_to_ptr.vmem [resolvable:$true] %s15_s10 }
   0x4   :  { %p275_p1 = scmp.lt.u32.totalorder %s271_s13, %s411_s0 }
   0x6   :  { %p277_p2 = pnand %p275_p1, %p272_p0 }
   0x8   :  { %280 = shalt.err (!%p277_p2)
}
   0x9   :  { %s281_s18 = scalar_lea.vmem %s16_s10, 2048  ;;  %p286_p4 = scmp.lt.s32.totalorder %s16_s10, %s16_s10 }
   0xa   :  { %p282_p3 = scmp.ne.s32.totalorder %s16_s10, %s281_s18  ;;  %p287_p5 = scmp.lt.s32.totalorder %s281_s18, %s281_s18 }
   0xc   :  { %p288_p6 = por %p287_p5, %p286_p4 }
   0xe   :  { %p289_p7 = pnand %p288_p6, %p282_p3 }
  0x10   :  { %292 = shalt.err (!%p289_p7)
}
  0x11   :  { %s344_s19 = smov 128   ;;  %s345_s20 = smov 8  }
  0x12   :  { %21 = dma.hbm_to_vmem [thread:$0]  %s411_s0, 2048, %s16_s10, [#allocation3], %s344_s19, %s344_s19, %s345_s20  }
  0x13   :  { %s346_s23 = smov [#allocation5]   ;;  %s293_s27 = scalar_lea.hbm %s412_s1, 2048 }
  0x14   :  { %s27_s24 = sshll.u32 %s346_s23, 4  ;;  %p294_p8 = scmp.ne.s32.totalorder %s412_s1, %s293_s27  ;;  %s28_s24 = int_to_ptr.vmem [resolvable:$true] %s27_s24 }
  0x15   :  { %p297_p9 = scmp.lt.u32.totalorder %s293_s27, %s412_s1 }
  0x17   :  { %p299_p10 = pnand %p297_p9, %p294_p8 }
  0x19   :  { %302 = shalt.err (!%p299_p10)
}
  0x1a   :  { %s303_s4 = scalar_lea.vmem %s28_s24, 2048  ;;  %p308_p12 = scmp.lt.s32.totalorder %s28_s24, %s28_s24 }
  0x1b   :  { %p304_p11 = scmp.ne.s32.totalorder %s28_s24, %s303_s4  ;;  %p309_p13 = scmp.lt.s32.totalorder %s303_s4, %s303_s4 }
  0x1d   :  { %p310_p0 = por %p309_p13, %p308_p12 }
  0x1f   :  { %p311_p1 = pnand %p310_p0, %p304_p11 }
  0x21   :  { %314 = shalt.err (!%p311_p1)
}
  0x22   :  { %33 = dma.hbm_to_vmem [thread:$0]  %s412_s1, 2048, %s28_s24, [#allocation6], %s344_s19, %s344_s19, %s345_s20  }
  0x23   :  { %337 = dma.done.wait [#allocation3], 2048  }
  0x24   :  { %338 = vsyncadd [#allocation3], 4294965248 }
  0x25   :  { %339 = dma.done.wait [#allocation6], 2048  }
  0x26   :  { %340 = vsyncadd [#allocation6], 4294965248  ;;  %v347_v0 = vmov 0.0|0.0   ;;  %vm348_vm0 = vmmov 0   ;;  %v349_v1 = vmov 0.0   ;;  %v40_v2 = vld [vmem:[#allocation2] sm:$0xff] }
  0x27   :  { %234 = vmatprep.subr.bf16.mxu0 %v347_v0  ;;  %231 = vmatprep.mubr.msk.f32.mxu0 %vm348_vm0, %v349_v1  ;;  %v41_v3 = vld [vmem:[#allocation2 + $0x8] sm:$0xff]  ;;  %v56_v4 = vld [vmem:[#allocation5] sm:$0xff]  ;;  %v42_v8 = vld [vmem:[#allocation2 + $0x10] sm:$0xff]  ;;  %v350_v58 = vmov 1.0   ;;  %s351_s1 = smov [#allocation7]  }
  0x28   :  { %v57_v5 = vld [vmem:[#allocation5 + $0x8] sm:$0xff]  ;;  %v72_v6 = vmul.f32 %v56_v4, %v40_v2  ;;  %v43_v9 = vld [vmem:[#allocation2 + $0x18] sm:$0xff]  ;;  %v58_v10 = vld [vmem:[#allocation5 + $0x10] sm:$0xff]  ;;  %s171_s6 = sshll.u32 %s351_s1, 4  ;;  %s172_s6 = int_to_ptr.vmem [resolvable:$true] %s171_s6 }
  0x29   :  { %v73_v7 = vmul.f32 %v57_v5, %v41_v3  ;;  %v59_v11 = vld [vmem:[#allocation5 + $0x18] sm:$0xff]  ;;  %v74_v13 = vmul.f32 %v58_v10, %v42_v8  ;;  %v44_v16 = vld [vmem:[#allocation2 + $0x20] sm:$0xff]  ;;  %v45_v17 = vld [vmem:[#allocation2 + $0x28] sm:$0xff]  ;;  %s315_s7 = scalar_lea.vmem %s172_s6, 16  ;;  %s319_s8 = scalar_lea.vmem %s172_s6, 32 }
  0x2a   :  { %v75_v14 = vmul.f32 %v59_v11, %v43_v9  ;;  %v60_v18 = vld [vmem:[#allocation5 + $0x20] sm:$0xff]  ;;  %v61_v19 = vld [vmem:[#allocation5 + $0x28] sm:$0xff]  ;;  %v46_v23 = vld [vmem:[#allocation2 + $0x30] sm:$0xff]  ;;  %p316_p2 = scmp.ne.s32.totalorder %s172_s6, %s315_s7  ;;  %p320_p3 = scmp.lt.s32.totalorder %s172_s6, %s172_s6 }
  0x2b   :  { %v235_v12 = vpack.c.bf16 %v73_v7, %v72_v6  ;;  %v76_v20 = vmul.f32 %v60_v18, %v44_v16  ;;  %v77_v21 = vmul.f32 %v61_v19, %v45_v17  ;;  %v47_v24 = vld [vmem:[#allocation2 + $0x38] sm:$0xff]  ;;  %v62_v25 = vld [vmem:[#allocation5 + $0x30] sm:$0xff]  ;;  %v48_v30 = vld [vmem:[#allocation2 + $0x40] sm:$0xff]  ;;  %p321_p4 = scmp.lt.s32.totalorder %s319_s8, %s315_s7 }
  0x2c   :  { %v238_v15 = vpack.c.bf16 %v75_v14, %v74_v13  ;;  %v63_v26 = vld [vmem:[#allocation5 + $0x38] sm:$0xff]  ;;  %v78_v27 = vmul.f32 %v62_v25, %v46_v23  ;;  %v49_v31 = vld [vmem:[#allocation2 + $0x48] sm:$0xff]  ;;  %v64_v32 = vld [vmem:[#allocation5 + $0x40] sm:$0xff] }
  0x2d   :  { %236 = vmatpush3.bf16.xpose.msra.mxu0 %v235_v12  ;;  %v241_v22 = vpack.c.bf16 %v77_v21, %v76_v20  ;;  %v79_v28 = vmul.f32 %v63_v26, %v47_v24  ;;  %v65_v33 = vld [vmem:[#allocation5 + $0x48] sm:$0xff]  ;;  %v80_v34 = vmul.f32 %v64_v32, %v48_v30  ;;  %v50_v37 = vld [vmem:[#allocation2 + $0x50] sm:$0xff]  ;;  %v51_v38 = vld [vmem:[#allocation2 + $0x58] sm:$0xff]  ;;  %p322_p5 = por %p321_p4, %p320_p3 }
  0x2e   :  { %237 = vmatprep.subr.bf16.mxu0 %v347_v0  ;;  %v81_v35 = vmul.f32 %v65_v33, %v49_v31  ;;  %v66_v39 = vld [vmem:[#allocation5 + $0x50] sm:$0xff]  ;;  %v67_v40 = vld [vmem:[#allocation5 + $0x58] sm:$0xff]  ;;  %v52_v44 = vld [vmem:[#allocation2 + $0x60] sm:$0xff] }
  0x2f   :  { %v244_v29 = vpack.c.bf16 %v79_v28, %v78_v27  ;;  %v82_v41 = vmul.f32 %v66_v39, %v50_v37  ;;  %v83_v42 = vmul.f32 %v67_v40, %v51_v38  ;;  %v53_v45 = vld [vmem:[#allocation2 + $0x68] sm:$0xff]  ;;  %v68_v46 = vld [vmem:[#allocation5 + $0x60] sm:$0xff]  ;;  %v54_v51 = vld [vmem:[#allocation2 + $0x70] sm:$0xff]  ;;  %p323_p6 = pnand %p322_p5, %p316_p2 }
  0x30   :  { %v247_v36 = vpack.c.bf16 %v81_v35, %v80_v34  ;;  %v69_v47 = vld [vmem:[#allocation5 + $0x68] sm:$0xff]  ;;  %v84_v48 = vmul.f32 %v68_v46, %v52_v44  ;;  %v55_v52 = vld [vmem:[#allocation2 + $0x78] sm:$0xff]  ;;  %v70_v53 = vld [vmem:[#allocation5 + $0x70] sm:$0xff] }
  0x31   :  { %v250_v43 = vpack.c.bf16 %v83_v42, %v82_v41  ;;  %v85_v49 = vmul.f32 %v69_v47, %v53_v45  ;;  %v71_v54 = vld [vmem:[#allocation5 + $0x78] sm:$0xff]  ;;  %v86_v55 = vmul.f32 %v70_v53, %v54_v51 }
  0x32   :  { %v87_v56 = vmul.f32 %v71_v54, %v55_v52 }
  0x33   :  { %v253_v50 = vpack.c.bf16 %v85_v49, %v84_v48 }
  0x34   :  { %v256_v57 = vpack.c.bf16 %v87_v56, %v86_v55 }
  0x35   :  { %239 = vmatpush3.bf16.xpose.msra.mxu0 %v238_v15 }
  0x36   :  { %240 = vmatprep.subr.bf16.mxu0 %v347_v0 }
  0x3d   :  { %242 = vmatpush3.bf16.xpose.msra.mxu0 %v241_v22 }
  0x3e   :  { %243 = vmatprep.subr.bf16.mxu0 %v347_v0 }
  0x45   :  { %245 = vmatpush3.bf16.xpose.msra.mxu0 %v244_v29 }
  0x46   :  { %246 = vmatprep.subr.bf16.mxu0 %v347_v0 }
  0x4d   :  { %248 = vmatpush3.bf16.xpose.msra.mxu0 %v247_v36 }
  0x4e   :  { %249 = vmatprep.subr.bf16.mxu0 %v347_v0 }
  0x55   :  { %251 = vmatpush3.bf16.xpose.msra.mxu0 %v250_v43 }
  0x56   :  { %252 = vmatprep.subr.bf16.mxu0 %v347_v0 }
  0x5d   :  { %254 = vmatpush3.bf16.xpose.msra.mxu0 %v253_v50 }
  0x5e   :  { %255 = vmatprep.subr.bf16.mxu0 %v347_v0 }
  0x65   :  { %257 = vmatpush3.bf16.xpose.msra.mxu0 %v256_v57 }
  0x6c   :  { %232 = vmatmul.mubr.f32.vlgmr.msra.gmra.mrb[0].mxu0 %v350_v58 }
 0x13f   :  { %v154_v59 = vpop.f32.mrb[0].mxu0 }
 0x140   :  { %v181_v60 = vmul.f32 -1.442695, %v154_v59  ;;  %v233_v61 = vpop.f32.mrb[1].mxu0 }
 0x142   :  { %267 = vpow2.f32 %v181_v60 }
 0x14c   :  { %v268_v62 = vpop.eup %267 }
 0x14d   :  { %v161_v63 = vadd.f32 1.0, %v268_v62 }
 0x14f   :  { %269 = vrcp.f32 %v161_v63 }
 0x159   :  { %v270_v1 = vpop.eup %269 }
 0x15a   :  { %164 = vst [vmem:[#allocation7] sm:$0x1] %v270_v1 }
 0x15b   :  { %326 = shalt.err (!%p323_p6)
}
 0x15c   :  { %s327_s11 = scalar_lea.hbm %s413_s2, 16 }
 0x15d   :  { %p328_p7 = scmp.ne.s32.totalorder %s413_s2, %s327_s11  ;;  %p331_p8 = scmp.lt.u32.totalorder %s327_s11, %s413_s2 }
 0x15f   :  { %p333_p9 = pnand %p331_p8, %p328_p7 }
 0x161   :  { %336 = shalt.err (!%p333_p9)
}
 0x162   :  { %174 = dma.vmem_to_hbm [thread:$0]  %s172_s6, 16, %s413_s2, [#allocation4]  }
 0x163   :  { %341 = dma.done.wait [#allocation4], 16  }
 0x164   :  { %342 = vsyncadd [#allocation4], 4294967280 }
 0x165   :  { %178 = vsyncpa [#allocation3], 1 }
 0x166   :  { %179 = vsyncpa [#allocation6], 1 }
 0x167   :  { %180 = vsyncpa [#allocation4], 1 }

</bundles_post_ra>
